<compile_context>
chip_gen: v5e
topology: v5e:2x2
jax: 0.10.0
libtpu: 0.0.40
codegen_flags: <defaults>
</compile_context>

<pallas_src>
import functools

import jax
import jax.numpy as jnp
from jax import lax
from jax.experimental import pallas as pl
from jax.experimental.pallas import tpu as pltpu


def _categorical_acc_kernel(n_total, yp_ref, y_ref, count_ref):
    tn, c = yp_ref.shape
    scores = yp_ref[...]                                   # [TN, C], input dtype

    # argmax over classes with first-occurrence tie-break (== torch.max).
    max_val = jnp.max(scores, axis=1, keepdims=True)       # [TN, 1]
    col_ids = lax.broadcasted_iota(jnp.int32, scores.shape, 1)
    idx = jnp.min(
        jnp.where(scores == max_val, col_ids, jnp.int32(c)),
        axis=1,
        keepdims=True,
    )                                                      # [TN, 1] int32

    correct = idx == y_ref[...]                            # [TN, 1] bool

    # Mask out padded tail rows of the last (partial) block.
    row_ids = pl.program_id(0) * tn + lax.broadcasted_iota(jnp.int32, (tn, 1), 0)
    valid = row_ids < n_total
    count_ref[0, 0] = jnp.sum(jnp.logical_and(correct, valid).astype(jnp.int32))


def _pick_tile_n(n, c, itemsize, vmem_budget_bytes):
    # Sublane packing: 8 rows per vreg for 32-bit, 16 for bf16, 32 for int8.
    pack = 8 * max(1, 4 // itemsize)
    lane_c = max(c, 128)  # lane dim pads to 128 for small C
    tile = vmem_budget_bytes // (2 * lane_c * itemsize)     # 2x = double-buffer
    tile = max(pack, (tile // pack) * pack)
    tile = min(tile, 2048)                                  # diminishing returns
    if n >= pack:
        tile = min(tile, (n // pack) * pack)                # keep block <= N
    else:
        tile = pack
    return int(tile)


def categorical_acc(y_pred, y, *, tile_n=None, vmem_budget_bytes=24 * 1024 * 1024):
    """y_pred: [N, C] float (f32/bf16), y: [N, 1] int.  Returns scalar accuracy (f32)."""
    n, c = y_pred.shape
    y = y.astype(jnp.int32).reshape(n, 1)
    itemsize = jnp.dtype(y_pred.dtype).itemsize

    if tile_n is None:
        tile_n = _pick_tile_n(n, c, itemsize, vmem_budget_bytes)

    num_tiles = pl.cdiv(n, tile_n)

    lane_c = max(c, 128)
    vmem_bytes = (
        2 * tile_n * lane_c * itemsize   # double-buffered y_pred tile
        + 2 * tile_n * 128 * 4           # double-buffered labels tile (lane-padded)
        + (4 << 20)                      # headroom
    )
    vmem_bytes = int(min(vmem_bytes, 48 << 20))  # stay safely inside v7x's 64 MiB

    counts = pl.pallas_call(
        functools.partial(_categorical_acc_kernel, n),
        out_shape=jax.ShapeDtypeStruct((num_tiles, 1), jnp.int32),
        grid_spec=pltpu.PrefetchScalarGridSpec(
            num_scalar_prefetch=0,
            grid=(num_tiles,),
            in_specs=[
                pl.BlockSpec((tile_n, c), lambda i: (i, 0)),
                pl.BlockSpec((tile_n, 1), lambda i: (i, 0)),
            ],
            out_specs=pl.BlockSpec(
                (1, 1), lambda i: (i, 0), memory_space=pltpu.SMEM
            ),
        ),
        compiler_params=pltpu.CompilerParams(
            dimension_semantics=("parallel",),
            vmem_limit_bytes=vmem_bytes,
        ),
    )(y_pred, y)

    num_correct = jnp.sum(counts).astype(jnp.float32)
    return num_correct / jnp.float32(n)


def _ref_acc(y_pred, y):
    idx = jnp.argmax(y_pred, axis=1)
    correct = (idx == y.reshape(1, -1)).reshape(-1)
    return jnp.sum(correct).astype(jnp.float32) / correct.shape[0]


if __name__ == "__main__":
    key = jax.random.PRNGKey(0)

    # Test 1: small f32, exact tile fit.
    k1, k2, key = jax.random.split(key, 3)
    N, C = 8, 16
    y_pred = jax.random.normal(k1, (N, C), dtype=jnp.float32)
    y = jax.random.randint(k2, (N, 1), 0, C, dtype=jnp.int32)
    acc = jax.block_until_ready(categorical_acc(y_pred, y))
    assert abs(float(acc) - float(_ref_acc(y_pred, y))) < 1e-6, (
        float(acc), float(_ref_acc(y_pred, y)))

    # Test 2: ragged N (exercises cdiv grid + tail-row mask), small C.
    k1, k2, key = jax.random.split(key, 3)
    N2, C2 = 20, 10
    y_pred2 = jax.random.normal(k1, (N2, C2), dtype=jnp.float32)
    y2 = jax.random.randint(k2, (N2, 1), 0, C2, dtype=jnp.int32)
    acc2 = jax.block_until_ready(categorical_acc(y_pred2, y2))
    assert abs(float(acc2) - float(_ref_acc(y_pred2, y2))) < 1e-6, (
        float(acc2), float(_ref_acc(y_pred2, y2)))

    # Test 3: bf16 logits (no forced upcast, halves HBM traffic).
    k1, k2, key = jax.random.split(key, 3)
    N3, C3 = 32, 12
    y_pred3 = jax.random.normal(k1, (N3, C3), dtype=jnp.float32).astype(jnp.bfloat16)
    y3 = jax.random.randint(k2, (N3, 1), 0, C3, dtype=jnp.int32)
    acc3 = jax.block_until_ready(categorical_acc(y_pred3, y3))
    assert abs(float(acc3) - float(_ref_acc(y_pred3, y3))) < 1e-6, (
        float(acc3), float(_ref_acc(y_pred3, y3)))

    print("KERNEL_OK")
</pallas_src>

<mosaic_0001>
module attributes {stable_mosaic.version = 11 : i64} {
  func.func @_categorical_acc_kernel(%arg0: i32, %arg1: memref<8x16xf32, #tpu.memory_space<vmem>>, %arg2: memref<8x1xi32, #tpu.memory_space<vmem>>, %arg3: memref<1x1xi32, #tpu.memory_space<smem>>) attributes {dimension_semantics = [#tpu.dimension_semantics<parallel>], iteration_bounds = array<i64: 1>, scalar_prefetch = 0 : i64, scratch_operands = 0 : i64, tpu.core_type = #tpu.core_type<tc>, window_params = [{transform_indices = @transform_0, window_bounds = array<i64: 8, 16>}, {transform_indices = @transform_1, window_bounds = array<i64: 8, 1>}, {transform_indices = @transform_2, window_bounds = array<i64: 1, 1>}]} {
    %c0 = arith.constant 0 : index
    %c0_0 = arith.constant 0 : index
    %0 = vector.load %arg1[%c0, %c0_0] : memref<8x16xf32, #tpu.memory_space<vmem>>, vector<8x16xf32>
    %cst = arith.constant dense<0xFF800000> : vector<8xf32>
    %1 = vector.multi_reduction <maximumf>, %0, %cst [1] : vector<8x16xf32> to vector<8xf32>
    %2 = vector.shape_cast %1 : vector<8xf32> to vector<8x1xf32>
    %3 = tpu.iota {dimensions = array<i32: 1>} : vector<8x16xi32>
    %4 = vector.broadcast %2 : vector<8x1xf32> to vector<8x16xf32>
    %5 = arith.cmpf oeq, %0, %4 : vector<8x16xf32>
    %c16_i32 = arith.constant 16 : i32
    %6 = vector.broadcast %c16_i32 : i32 to vector<8x16xi32>
    %7 = arith.select %5, %3, %6 : vector<8x16xi1>, vector<8x16xi32>
    %cst_1 = arith.constant dense<2147483647> : vector<8xi32>
    %8 = vector.multi_reduction <minsi>, %7, %cst_1 [1] : vector<8x16xi32> to vector<8xi32>
    %9 = vector.shape_cast %8 : vector<8xi32> to vector<8x1xi32>
    %c0_2 = arith.constant 0 : index
    %c0_3 = arith.constant 0 : index
    %10 = vector.load %arg2[%c0_2, %c0_3] : memref<8x1xi32, #tpu.memory_space<vmem>>, vector<8x1xi32>
    %11 = arith.cmpi eq, %9, %10 : vector<8x1xi32>
    %c8_i32 = arith.constant 8 : i32
    %12 = arith.muli %arg0, %c8_i32 : i32
    %13 = tpu.iota {dimensions = array<i32: 0>} : vector<8x1xi32>
    %14 = vector.broadcast %12 : i32 to vector<8x1xi32>
    %15 = arith.addi %14, %13 : vector<8x1xi32>
    %c8_i32_4 = arith.constant 8 : i32
    %16 = vector.broadcast %c8_i32_4 : i32 to vector<8x1xi32>
    %17 = arith.cmpi slt, %15, %16 : vector<8x1xi32>
    %18 = arith.andi %11, %17 : vector<8x1xi1>
    %19 = arith.extui %18 : vector<8x1xi1> to vector<8x1xi32>
    %20 = vector.shape_cast %19 : vector<8x1xi32> to vector<1x8x1xi32>
    %cst_5 = arith.constant dense<0> : vector<1xi32>
    %21 = vector.multi_reduction <add>, %20, %cst_5 [1, 2] : vector<1x8x1xi32> to vector<1xi32>
    %22 = vector.shape_cast %21 : vector<1xi32> to vector<1x1x1xi32>
    %23 = vector.extract %22[0, 0, 0] : i32 from vector<1x1x1xi32>
    %c0_6 = arith.constant 0 : index
    %c0_7 = arith.constant 0 : index
    %24 = memref.load %arg3[%c0_6, %c0_7] : memref<1x1xi32, #tpu.memory_space<smem>>
    memref.store %23, %arg3[%c0_6, %c0_7] : memref<1x1xi32, #tpu.memory_space<smem>>
    return
  }
  func.func @transform_0(%arg0: i32) -> (i32, i32) {
    %c0_i32 = arith.constant 0 : i32
    %c0_i32_0 = arith.constant 0 : i32
    return %arg0, %c0_i32 : i32, i32
  }
  func.func @transform_1(%arg0: i32) -> (i32, i32) {
    %c0_i32 = arith.constant 0 : i32
    %c0_i32_0 = arith.constant 0 : i32
    return %arg0, %c0_i32 : i32, i32
  }
  func.func @transform_2(%arg0: i32) -> (i32, i32) {
    %c0_i32 = arith.constant 0 : i32
    %c0_i32_0 = arith.constant 0 : i32
    return %arg0, %c0_i32 : i32, i32
  }
}

</mosaic_0001>

<bundles_post_ra>
// kernel: tpu_custom_call.1
= control target key start
LH: loop header
LB: loop body
LE: loop exit
PB: predicated region body
PF: predicated region fallthrough
CT: control target
= control target key end

     0   :  { %vm13_vm0 = vcmask 130048   ;;  %s128_s0 = inlined_call_operand.vmem [shape: f32[8,16], index: 0, kind: input, shape index: {}]   ;;  %s129_s1 = inlined_call_operand.vmem [shape: s32[8,1], index: 1, kind: input, shape index: {}]   ;;  %s130_s2 = inlined_call_operand.hbm [shape: s32[1,1], index: 2, kind: output, shape index: {}]  }
   0x1   :  { %v12_v0 = vld [vmem:[%s128_s0] sm:$0xff] }
   0x2   :  { %7 = vsyncpa [#allocation3], 0  ;;  %v14_v1 = vsel %vm13_vm0, %v12_v0, -inf  ;;  %v17_v2 = vlaneseq  ;;  %v36_v17 = vld [vmem:[%s129_s1] sm:$0xff]  ;;  %vm46_vm3 = vcmask 7168   ;;  %v102_v19 = vmov 0  }
   0x3   :  { %15 = vmax.xlane.f32.xlu0 %v14_v1  ;;  %s74_s13 = sshll.u32 %s130_s2, 4  ;;  %s103_s15 = smov [#allocation2]   ;;  %s75_s13 = int_to_ptr.hbm [resolvable:$true] %s74_s13 }
   0x4   :  { %v18_v3 = vand.u32 127, %v17_v2 }
  0x76   :  { %v16_v4 = vpop.xlane.xlu0 %15 }
  0x77   :  { %vm19_vm1 = vcmp.eq.f32.partialorder %v12_v0, %v16_v4 }
  0x78   :  { %v20_v5 = vsel %vm19_vm1, %v18_v3, 16 }
  0x79   :  { %v21_v6 = vsel %vm13_vm0, %v20_v5, 2147483647 }
  0x7a   :  { %v23_v7 = vshra.s32 %v21_v6, 16  ;;  %v22_v9 = vand.u32 65535, %v21_v6 }
  0x7c   :  { %v25_v8 = vcvt.s32.f32 %v23_v7  ;;  %v24_v11 = vcvt.s32.f32 %v22_v9 }
  0x7e   :  { %26 = vmin.xlane.f32.xlu0 %v25_v8 }
  0xf1   :  { %v27_v10 = vpop.xlane.xlu0 %26 }
  0xf2   :  { %vm28_vm2 = vcmp.eq.f32.partialorder %v25_v8, %v27_v10  ;;  %v33_v13 = vcvt.f32.s32 %v27_v10 }
  0xf3   :  { %v29_v12 = vsel %vm28_vm2, %v24_v11, inf }
  0xf4   :  { %30 = vmin.xlane.f32.xlu1 %v29_v12  ;;  %v34_v15 = vshll.u32 %v33_v13, 16 }
 0x167   :  { %v31_v14 = vpop.xlane.xlu1 %30 }
 0x168   :  { %v32_v16 = vcvt.f32.s32 %v31_v14 }
 0x16a   :  { %v35_v18 = vadd.s32 %v34_v15, %v32_v16 }
 0x16c   :  { %vm37_vm4 = vcmp.eq.s32.totalorder %v35_v18, %v36_v17 }
 0x16d   :  { %v45_v20 = vsel %vm37_vm4, 1, %v102_v19 }
 0x16e   :  { %v47_v21 = vsel %vm46_vm3, %v45_v20, 0 }
 0x16f   :  { %v49_v22 = vshrl.u32 %v47_v21, 16  ;;  %v48_v23 = vand.u32 65535, %v47_v21 }
 0x171   :  { %v51_v24 = vcvt.s32.f32 %v49_v22  ;;  %v50_v25 = vcvt.s32.f32 %v48_v23 }
 0x173   :  { %54 = vadd.xlane.f32.xlu1 %v51_v24  ;;  %52 = vadd.xlane.f32.xlu2 %v50_v25 }
 0x1e6   :  { %v55_v26 = vpop.xlane.xlu1 %54  ;;  %v53_v27 = vpop.xlane.xlu2 %52 }
 0x1e7   :  { %v57_v28 = vcvt.f32.s32 %v55_v26  ;;  %v56_v30 = vcvt.f32.s32 %v53_v27 }
 0x1e9   :  { %v58_v29 = vshll.u32 %v57_v28, 16 }
 0x1eb   :  { %v59_v31 = vadd.s32 %v58_v29, %v56_v30 }
 0x1ed   :  { %v60_v32 = vrot.slane %v59_v31, 4 }
 0x1ef   :  { %v61_v33 = vadd.s32 %v60_v32, %v59_v31 }
 0x1f1   :  { %v62_v34 = vrot.slane %v61_v33, 2 }
 0x1f3   :  { %v63_v35 = vadd.s32 %v62_v34, %v61_v33 }
 0x1f5   :  { %v64_v36 = vrot.slane %v63_v35, 1 }
 0x1f7   :  { %v65_v37 = vadd.s32 %v64_v36, %v63_v35 }
 0x1f9   :  { %84 = vpush %v65_v37 }
 0x22a   :  { %s85_s14 = spop %84 }
 0x22b   :  { %68 = sst [smem:[#allocation2]] %s85_s14 }
 0x22c   :  { %77 = dma.smem_to_hbm %s103_s15, 16, %s75_s13, [#allocation3]  }
 0x22d   :  { %100 = dma.done.wait [#allocation3], 16  }
 0x22e   :  { %101 = vsyncadd [#allocation3], 4294967280 }
 0x22f   :  { %82 = sfence }
 0x230   :  { %83 = vsyncpa [#allocation3], 1 }

</bundles_post_ra>
